<compile_context>
chip_gen: v7x
topology: tpu7x:2x2x1
jax: 0.10.0
libtpu: 0.0.40
codegen_flags: <defaults>
</compile_context>

<pallas_src>
import jax
import jax.numpy as jnp
import numpy as np
from jax import lax
from jax.experimental import pallas as pl
from jax.experimental.pallas import tpu as pltpu

# --- config (mirrors config.model.*) -------------------------------------
B = 2          # batch
C_IN = 4       # cnn_in_channels
C1 = 8         # cnn_out_channels_l1
C2 = 8         # cnn_out_channels_l2
C3 = 8         # cnn_out_channels_l3
W = 32         # window_size
P = 2          # max_pool_size

K1 = 16                       # unified tap frame for the three l1 branches
K2 = 8                        # conv_l2 kernel size
K3 = 4                        # conv_l3 kernel size
PADMAX = 8                    # largest conv_l1 padding (k=16, pad=8)
L1 = W + 1                    # length after each conv_l1 branch (33)
LP = L1 // P                  # length after MaxPool1d(P)        (16)
L2 = LP + 2 * 2 - K2 + 1      # after conv_l2 (k=8, pad=2)       (13)
L3 = L2 + 2 * 2 - K3 + 1      # after conv_l3 (k=4, pad=2)       (14)
FC_IN = C3 * L3               # 112

# padded per-batch lane strides (keep every slab block 8-row aligned)
L1P = 40                      # layer-1 feature maps: 33 valid + 7 pad lanes
LSP = 16                      # pooled / l2 / l3 feature maps (16 / 13 / 14 valid)
NH1 = B * L1P                 # 80 lanes for h1 / patches1
NP = B * LSP                  # 32 lanes for pooled / h2 / h3
OUT_LANES = 128               # lane-dense output width

# --- weight/selection slab row offsets (all multiples of 8) ---------------
R_W1 = 0                      # (24, 64) fused l1 weight  | b1 at lane 64
R_W2 = R_W1 + 3 * C1          # (64, 24) per-tap l2 weight| b2 at lane 24
R_W3 = R_W2 + K2 * C2         # (32, 8)  per-tap l3 weight| b3 at lane 8
R_FC = R_W3 + K3 * C3         # (8, NP)  tiled fc weight  | bfc at lane NP
R_SE = R_FC + 8               # (NH1, NP) maxpool "even" selection
R_SO = R_SE + NH1             # (NH1, NP) maxpool "odd"  selection
R_S2 = R_SO + NH1             # (K2*NP, NP) conv_l2 per-tap shift selections
R_S3 = R_S2 + K2 * NP         # (K3*NP, NP) conv_l3 per-tap shift selections
R_SS = R_S3 + K3 * NP         # (NP, 128)  per-batch lane-sum selection
SLAB_ROWS = R_SS + NP         # 704
SLAB_LANES = 128


# --------------------------- Pallas kernel --------------------------------
def _cnn_kernel(p1_ref, slab_ref, out_ref):
    patches1 = p1_ref[...]                                             # (64, NH1)

    # ---- layer 1: all three conv_l1 branches fused into ONE matmul --------
    w1 = slab_ref[R_W1:R_W1 + 3 * C1, 0:K1 * C_IN]                     # (24, 64)
    b1 = slab_ref[R_W1:R_W1 + 3 * C1, K1 * C_IN:K1 * C_IN + 1]         # (24, 1)
    h1 = jnp.dot(w1, patches1, preferred_element_type=jnp.float32) + b1  # (24, NH1)

    # ---- MaxPool1d(2): even/odd lane selection on the MXU + one VPU max ----
    sel_e = slab_ref[R_SE:R_SE + NH1, 0:NP]                            # (NH1, NP)
    sel_o = slab_ref[R_SO:R_SO + NH1, 0:NP]
    pooled = jnp.maximum(
        jnp.dot(h1, sel_e, preferred_element_type=jnp.float32),
        jnp.dot(h1, sel_o, preferred_element_type=jnp.float32))        # (24, NP)

    # ---- layer 2: conv_l2 as per-tap selection matmuls ---------------------
    w2v = slab_ref[R_W2:R_W2 + K2 * C2, 0:3 * C1]                      # (64, 24)
    b2 = slab_ref[R_W2:R_W2 + C2, 3 * C1:3 * C1 + 1]                   # (8, 1)
    t2 = jnp.dot(w2v, pooled, preferred_element_type=jnp.float32)      # (64, NP)
    h2 = jnp.zeros((C2, NP), jnp.float32)
    for k in range(K2):
        sel = slab_ref[R_S2 + k * NP:R_S2 + (k + 1) * NP, 0:NP]        # (NP, NP)
        h2 = h2 + jnp.dot(t2[k * C2:(k + 1) * C2, :], sel,
                          preferred_element_type=jnp.float32)
    h2 = h2 + b2                                                       # (8, NP)

    # ---- layer 3: conv_l3 as per-tap selection matmuls ---------------------
    w3v = slab_ref[R_W3:R_W3 + K3 * C3, 0:C2]                          # (32, 8)
    b3 = slab_ref[R_W3:R_W3 + C3, C2:C2 + 1]                           # (8, 1)
    t3 = jnp.dot(w3v, h2, preferred_element_type=jnp.float32)          # (32, NP)
    h3 = jnp.zeros((C3, NP), jnp.float32)
    for k in range(K3):
        sel = slab_ref[R_S3 + k * NP:R_S3 + (k + 1) * NP, 0:NP]        # (NP, NP)
        h3 = h3 + jnp.dot(t3[k * C3:(k + 1) * C3, :], sel,
                          preferred_element_type=jnp.float32)
    h3 = h3 + b3                                                       # (8, NP)

    # ---- flatten(1,2) + Linear(FC_IN, 1): reductions on the MXU ------------
    wfc = slab_ref[R_FC:R_FC + C3, 0:NP]                               # (8, NP)
    bfc = slab_ref[R_FC:R_FC + 1, NP:NP + 1]                           # (1, 1)
    prod = h3 * wfc                                                    # (8, NP)
    rows = jnp.dot(jnp.ones((8, C3), jnp.float32), prod,
                   preferred_element_type=jnp.float32)                 # (8, NP)
    ssum = slab_ref[R_SS:R_SS + NP, 0:OUT_LANES]                       # (NP, 128)
    out_ref[...] = (jnp.dot(rows, ssum, preferred_element_type=jnp.float32)
                    + bfc)                                             # (8, 128)


# ------------------------ host-side slab packing (cached) ------------------
def make_slab(params):
    """Pack all weights, biases and 0/1 selection matrices into one slab.

    Depends only on the parameters (and the static batch B) — call once and
    reuse the result for every forward pass.
    """
    w4, b4, w8, b8, w16, b16, w2, b2, w3, b3, wfc, bfc = [
        np.asarray(p, np.float32) for p in params]
    slab = np.zeros((SLAB_ROWS, SLAB_LANES), np.float32)

    def embed_l1(w, off):
        # (Cout, Cin, K) -> (Cout, K1*Cin), taps at frame positions [off, off+K)
        K = w.shape[-1]
        buf = np.zeros((C1, K1, C_IN), np.float32)
        buf[:, off:off + K, :] = np.transpose(w, (0, 2, 1))
        return buf.reshape(C1, K1 * C_IN)

    w1 = np.concatenate([embed_l1(w4, PADMAX - 2),
                         embed_l1(w8, PADMAX - 4),
                         embed_l1(w16, PADMAX - 8)], axis=0)           # (24, 64)
    slab[R_W1:R_W1 + 3 * C1, 0:K1 * C_IN] = w1
    slab[R_W1:R_W1 + 3 * C1, K1 * C_IN] = np.concatenate([b4, b8, b16])

    # per-tap l2/l3 weights, rows k*Cout + c
    slab[R_W2:R_W2 + K2 * C2, 0:3 * C1] = (
        np.transpose(w2, (2, 0, 1)).reshape(K2 * C2, 3 * C1))
    slab[R_W2:R_W2 + C2, 3 * C1] = b2
    slab[R_W3:R_W3 + K3 * C3, 0:C2] = (
        np.transpose(w3, (2, 0, 1)).reshape(K3 * C3, C2))
    slab[R_W3:R_W3 + C3, C2] = b3

    # fc weight tiled per batch (dead lanes stay zero), bias at lane NP
    wfc_mat = wfc.reshape(C3, L3)
    for b in range(B):
        slab[R_FC:R_FC + C3, b * LSP:b * LSP + L3] = wfc_mat
    slab[R_FC, NP] = bfc[0]

    # maxpool even/odd lane selections: pooled[:, b*LSP+j] from h1 lanes 2j / 2j+1
    for b in range(B):
        for j in range(LP):
            slab[R_SE + b * L1P + 2 * j, b * LSP + j] = 1.0
            slab[R_SO + b * L1P + 2 * j + 1, b * LSP + j] = 1.0

    # conv_l2 per-tap shift (pad=2); only valid pooled lanes l are selected
    for k in range(K2):
        for b in range(B):
            for j in range(L2):
                l = j + k - 2
                if 0 <= l < LP:
                    slab[R_S2 + k * NP + b * LSP + l, b * LSP + j] = 1.0

    # conv_l3 per-tap shift (pad=2); only valid h2 lanes (l < L2) are selected
    for k in range(K3):
        for b in range(B):
            for j in range(L3):
                l = j + k - 2
                if 0 <= l < L2:
                    slab[R_S3 + k * NP + b * LSP + l, b * LSP + j] = 1.0

    # per-batch lane-sum of the fc products (columns >= B stay zero)
    for b in range(B):
        for j in range(L3):
            slab[R_SS + b * LSP + j, b] = 1.0

    return jnp.asarray(slab)


# ------------------------------ jitted forward ------------------------------
def _build_patches1(x):
    # im2col for the fused layer-1 conv, hoisted out of the kernel (XLA side):
    # patches1[k*C_IN + c, b*L1P + l] = x_pad8[b, c, l + k], zero for l >= L1.
    Bn = x.shape[0]
    x_pad = jnp.pad(x, ((0, 0), (0, 0), (PADMAX, PADMAX)))            # (B, C_IN, W+16)
    cols = jnp.stack([x_pad[:, :, k:k + L1] for k in range(K1)],
                     axis=1)                                          # (B, K1, C_IN, L1)
    p = cols.reshape(Bn, K1 * C_IN, L1)
    p = jnp.pad(p, ((0, 0), (0, 0), (0, L1P - L1)))                   # (B, 64, L1P)
    return jnp.transpose(p, (1, 0, 2)).reshape(K1 * C_IN, Bn * L1P)   # (64, B*L1P)


@jax.jit
def cnn_forward_packed(x, slab):
    # TODO(synk): for throughput-sized batches, widen the lane folding toward
    # >=256 lanes and add a "parallel" batch grid axis (v7x dual-TC); at B=2
    # the whole net is overhead-bound and a single invocation is optimal.
    Bn = x.shape[0]
    patches1 = _build_patches1(x)
    out = pl.pallas_call(
        _cnn_kernel,
        out_shape=jax.ShapeDtypeStruct((8, OUT_LANES), jnp.float32),
        in_specs=[pl.BlockSpec(memory_space=pltpu.MemorySpace.VMEM),
                  pl.BlockSpec(memory_space=pltpu.MemorySpace.VMEM)],
        out_specs=pl.BlockSpec(memory_space=pltpu.MemorySpace.VMEM),
    )(patches1, slab)
    return out[0, :Bn].reshape(Bn, 1)


# --------------------------- params & reference ----------------------------
def init_params(key):
    ks = jax.random.split(key, 12)
    s = 0.1
    w4 = s * jax.random.normal(ks[0], (C1, C_IN, 4), jnp.float32)
    b4 = s * jax.random.normal(ks[1], (C1,), jnp.float32)
    w8 = s * jax.random.normal(ks[2], (C1, C_IN, 8), jnp.float32)
    b8 = s * jax.random.normal(ks[3], (C1,), jnp.float32)
    w16 = s * jax.random.normal(ks[4], (C1, C_IN, 16), jnp.float32)
    b16 = s * jax.random.normal(ks[5], (C1,), jnp.float32)
    w2 = s * jax.random.normal(ks[6], (C2, 3 * C1, 8), jnp.float32)
    b2 = s * jax.random.normal(ks[7], (C2,), jnp.float32)
    w3 = s * jax.random.normal(ks[8], (C3, C2, 4), jnp.float32)
    b3 = s * jax.random.normal(ks[9], (C3,), jnp.float32)
    wfc = s * jax.random.normal(ks[10], (1, FC_IN), jnp.float32)
    bfc = s * jax.random.normal(ks[11], (1,), jnp.float32)
    return (w4, b4, w8, b8, w16, b16, w2, b2, w3, b3, wfc, bfc)


def _conv1d_ref(x, w, b, pad):
    y = lax.conv_general_dilated(x, w, window_strides=(1,), padding=[(pad, pad)],
                                 dimension_numbers=('NCH', 'OIH', 'NCH'))
    return y + b[None, :, None]


def cnn_ref(x, params):
    w4, b4, w8, b8, w16, b16, w2, b2, w3, b3, wfc, bfc = params
    x4 = _conv1d_ref(x, w4, b4, 2)
    x8 = _conv1d_ref(x, w8, b8, 4)
    x16 = _conv1d_ref(x, w16, b16, 8)
    h = jnp.concatenate([x4, x8, x16], axis=1)
    lp = h.shape[-1] // P
    hp = h[:, :, :lp * P].reshape(h.shape[0], h.shape[1], lp, P).max(axis=-1)
    y2 = _conv1d_ref(hp, w2, b2, 2)
    y3 = _conv1d_ref(y2, w3, b3, 2)
    flat = y3.reshape(y3.shape[0], -1)
    return flat @ wfc.T + bfc


if __name__ == "__main__":
    key = jax.random.PRNGKey(0)
    kx, kp = jax.random.split(key)
    x = jax.random.normal(kx, (B, C_IN, W), jnp.float32)
    params = init_params(kp)

    slab = make_slab(params)              # packed ONCE per parameter set
    out = jax.block_until_ready(cnn_forward_packed(x, slab))
    ref = cnn_ref(x, params)
    np.testing.assert_allclose(np.asarray(out), np.asarray(ref), rtol=5e-2, atol=5e-2)
    assert out.shape == (B, 1)
    print("KERNEL_OK")
</pallas_src>

<mosaic_0001>
module attributes {stable_mosaic.version = 11 : i64} {
  func.func @_cnn_kernel(%arg0: memref<64x80xf32, #tpu.memory_space<vmem>>, %arg1: memref<704x128xf32, #tpu.memory_space<vmem>>, %arg2: memref<8x128xf32, #tpu.memory_space<vmem>>) attributes {dimension_semantics = [], scalar_prefetch = 0 : i64, scratch_operands = 0 : i64, tpu.core_type = #tpu.core_type<tc>} {
    %c0 = arith.constant 0 : index
    %c0_0 = arith.constant 0 : index
    %0 = vector.load %arg0[%c0, %c0_0] : memref<64x80xf32, #tpu.memory_space<vmem>>, vector<64x80xf32>
    %c0_1 = arith.constant 0 : index
    %c0_2 = arith.constant 0 : index
    %1 = vector.load %arg1[%c0_1, %c0_2] : memref<704x128xf32, #tpu.memory_space<vmem>>, vector<24x64xf32>
    %c0_3 = arith.constant 0 : index
    %c64 = arith.constant 64 : index
    %2 = vector.load %arg1[%c0_3, %c64] : memref<704x128xf32, #tpu.memory_space<vmem>>, vector<24x1xf32>
    %cst = arith.constant dense<0.000000e+00> : vector<24x80xf32>
    %3 = tpu.matmul %1, %0, %cst {dimension_numbers = #tpu.dot_dimension_numbers<[1], [0], [0], [1], [0, 0, 1, 1], [], []>} : vector<24x64xf32>, vector<64x80xf32>, vector<24x80xf32> -> vector<24x80xf32>
    %4 = vector.broadcast %2 : vector<24x1xf32> to vector<24x80xf32>
    %5 = arith.addf %3, %4 : vector<24x80xf32>
    %c128 = arith.constant 128 : index
    %c0_4 = arith.constant 0 : index
    %6 = vector.load %arg1[%c128, %c0_4] : memref<704x128xf32, #tpu.memory_space<vmem>>, vector<80x32xf32>
    %c208 = arith.constant 208 : index
    %c0_5 = arith.constant 0 : index
    %7 = vector.load %arg1[%c208, %c0_5] : memref<704x128xf32, #tpu.memory_space<vmem>>, vector<80x32xf32>
    %cst_6 = arith.constant dense<0.000000e+00> : vector<24x32xf32>
    %8 = tpu.matmul %5, %6, %cst_6 {dimension_numbers = #tpu.dot_dimension_numbers<[1], [0], [0], [1], [0, 0, 1, 1], [], []>} : vector<24x80xf32>, vector<80x32xf32>, vector<24x32xf32> -> vector<24x32xf32>
    %cst_7 = arith.constant dense<0.000000e+00> : vector<24x32xf32>
    %9 = tpu.matmul %5, %7, %cst_7 {dimension_numbers = #tpu.dot_dimension_numbers<[1], [0], [0], [1], [0, 0, 1, 1], [], []>} : vector<24x80xf32>, vector<80x32xf32>, vector<24x32xf32> -> vector<24x32xf32>
    %10 = arith.maximumf %8, %9 : vector<24x32xf32>
    %c24 = arith.constant 24 : index
    %c0_8 = arith.constant 0 : index
    %11 = vector.load %arg1[%c24, %c0_8] : memref<704x128xf32, #tpu.memory_space<vmem>>, vector<64x24xf32>
    %c24_9 = arith.constant 24 : index
    %c24_10 = arith.constant 24 : index
    %12 = vector.load %arg1[%c24_9, %c24_10] : memref<704x128xf32, #tpu.memory_space<vmem>>, vector<8x1xf32>
    %cst_11 = arith.constant dense<0.000000e+00> : vector<64x32xf32>
    %13 = tpu.matmul %11, %10, %cst_11 {dimension_numbers = #tpu.dot_dimension_numbers<[1], [0], [0], [1], [0, 0, 1, 1], [], []>} : vector<64x24xf32>, vector<24x32xf32>, vector<64x32xf32> -> vector<64x32xf32>
    %cst_12 = arith.constant 0.000000e+00 : f32
    %14 = vector.broadcast %cst_12 : f32 to vector<8x32xf32>
    %c288 = arith.constant 288 : index
    %c0_13 = arith.constant 0 : index
    %15 = vector.load %arg1[%c288, %c0_13] : memref<704x128xf32, #tpu.memory_space<vmem>>, vector<32x32xf32>
    %16 = vector.extract_strided_slice %13 {offsets = [0, 0], sizes = [8, 32], strides = [1, 1]} : vector<64x32xf32> to vector<8x32xf32>
    %cst_14 = arith.constant dense<0.000000e+00> : vector<8x32xf32>
    %17 = tpu.matmul %16, %15, %cst_14 {dimension_numbers = #tpu.dot_dimension_numbers<[1], [0], [0], [1], [0, 0, 1, 1], [], []>} : vector<8x32xf32>, vector<32x32xf32>, vector<8x32xf32> -> vector<8x32xf32>
    %18 = arith.addf %14, %17 : vector<8x32xf32>
    %c320 = arith.constant 320 : index
    %c0_15 = arith.constant 0 : index
    %19 = vector.load %arg1[%c320, %c0_15] : memref<704x128xf32, #tpu.memory_space<vmem>>, vector<32x32xf32>
    %20 = vector.extract_strided_slice %13 {offsets = [8, 0], sizes = [8, 32], strides = [1, 1]} : vector<64x32xf32> to vector<8x32xf32>
    %cst_16 = arith.constant dense<0.000000e+00> : vector<8x32xf32>
    %21 = tpu.matmul %20, %19, %cst_16 {dimension_numbers = #tpu.dot_dimension_numbers<[1], [0], [0], [1], [0, 0, 1, 1], [], []>} : vector<8x32xf32>, vector<32x32xf32>, vector<8x32xf32> -> vector<8x32xf32>
    %22 = arith.addf %18, %21 : vector<8x32xf32>
    %c352 = arith.constant 352 : index
    %c0_17 = arith.constant 0 : index
    %23 = vector.load %arg1[%c352, %c0_17] : memref<704x128xf32, #tpu.memory_space<vmem>>, vector<32x32xf32>
    %24 = vector.extract_strided_slice %13 {offsets = [16, 0], sizes = [8, 32], strides = [1, 1]} : vector<64x32xf32> to vector<8x32xf32>
    %cst_18 = arith.constant dense<0.000000e+00> : vector<8x32xf32>
    %25 = tpu.matmul %24, %23, %cst_18 {dimension_numbers = #tpu.dot_dimension_numbers<[1], [0], [0], [1], [0, 0, 1, 1], [], []>} : vector<8x32xf32>, vector<32x32xf32>, vector<8x32xf32> -> vector<8x32xf32>
    %26 = arith.addf %22, %25 : vector<8x32xf32>
    %c384 = arith.constant 384 : index
    %c0_19 = arith.constant 0 : index
    %27 = vector.load %arg1[%c384, %c0_19] : memref<704x128xf32, #tpu.memory_space<vmem>>, vector<32x32xf32>
    %28 = vector.extract_strided_slice %13 {offsets = [24, 0], sizes = [8, 32], strides = [1, 1]} : vector<64x32xf32> to vector<8x32xf32>
    %cst_20 = arith.constant dense<0.000000e+00> : vector<8x32xf32>
    %29 = tpu.matmul %28, %27, %cst_20 {dimension_numbers = #tpu.dot_dimension_numbers<[1], [0], [0], [1], [0, 0, 1, 1], [], []>} : vector<8x32xf32>, vector<32x32xf32>, vector<8x32xf32> -> vector<8x32xf32>
    %30 = arith.addf %26, %29 : vector<8x32xf32>
    %c416 = arith.constant 416 : index
    %c0_21 = arith.constant 0 : index
    %31 = vector.load %arg1[%c416, %c0_21] : memref<704x128xf32, #tpu.memory_space<vmem>>, vector<32x32xf32>
    %32 = vector.extract_strided_slice %13 {offsets = [32, 0], sizes = [8, 32], strides = [1, 1]} : vector<64x32xf32> to vector<8x32xf32>
    %cst_22 = arith.constant dense<0.000000e+00> : vector<8x32xf32>
    %33 = tpu.matmul %32, %31, %cst_22 {dimension_numbers = #tpu.dot_dimension_numbers<[1], [0], [0], [1], [0, 0, 1, 1], [], []>} : vector<8x32xf32>, vector<32x32xf32>, vector<8x32xf32> -> vector<8x32xf32>
    %34 = arith.addf %30, %33 : vector<8x32xf32>
    %c448 = arith.constant 448 : index
    %c0_23 = arith.constant 0 : index
    %35 = vector.load %arg1[%c448, %c0_23] : memref<704x128xf32, #tpu.memory_space<vmem>>, vector<32x32xf32>
    %36 = vector.extract_strided_slice %13 {offsets = [40, 0], sizes = [8, 32], strides = [1, 1]} : vector<64x32xf32> to vector<8x32xf32>
    %cst_24 = arith.constant dense<0.000000e+00> : vector<8x32xf32>
    %37 = tpu.matmul %36, %35, %cst_24 {dimension_numbers = #tpu.dot_dimension_numbers<[1], [0], [0], [1], [0, 0, 1, 1], [], []>} : vector<8x32xf32>, vector<32x32xf32>, vector<8x32xf32> -> vector<8x32xf32>
    %38 = arith.addf %34, %37 : vector<8x32xf32>
    %c480 = arith.constant 480 : index
    %c0_25 = arith.constant 0 : index
    %39 = vector.load %arg1[%c480, %c0_25] : memref<704x128xf32, #tpu.memory_space<vmem>>, vector<32x32xf32>
    %40 = vector.extract_strided_slice %13 {offsets = [48, 0], sizes = [8, 32], strides = [1, 1]} : vector<64x32xf32> to vector<8x32xf32>
    %cst_26 = arith.constant dense<0.000000e+00> : vector<8x32xf32>
    %41 = tpu.matmul %40, %39, %cst_26 {dimension_numbers = #tpu.dot_dimension_numbers<[1], [0], [0], [1], [0, 0, 1, 1], [], []>} : vector<8x32xf32>, vector<32x32xf32>, vector<8x32xf32> -> vector<8x32xf32>
    %42 = arith.addf %38, %41 : vector<8x32xf32>
    %c512 = arith.constant 512 : index
    %c0_27 = arith.constant 0 : index
    %43 = vector.load %arg1[%c512, %c0_27] : memref<704x128xf32, #tpu.memory_space<vmem>>, vector<32x32xf32>
    %44 = vector.extract_strided_slice %13 {offsets = [56, 0], sizes = [8, 32], strides = [1, 1]} : vector<64x32xf32> to vector<8x32xf32>
    %cst_28 = arith.constant dense<0.000000e+00> : vector<8x32xf32>
    %45 = tpu.matmul %44, %43, %cst_28 {dimension_numbers = #tpu.dot_dimension_numbers<[1], [0], [0], [1], [0, 0, 1, 1], [], []>} : vector<8x32xf32>, vector<32x32xf32>, vector<8x32xf32> -> vector<8x32xf32>
    %46 = arith.addf %42, %45 : vector<8x32xf32>
    %47 = vector.broadcast %12 : vector<8x1xf32> to vector<8x32xf32>
    %48 = arith.addf %46, %47 : vector<8x32xf32>
    %c88 = arith.constant 88 : index
    %c0_29 = arith.constant 0 : index
    %49 = vector.load %arg1[%c88, %c0_29] : memref<704x128xf32, #tpu.memory_space<vmem>>, vector<32x8xf32>
    %c88_30 = arith.constant 88 : index
    %c8 = arith.constant 8 : index
    %50 = vector.load %arg1[%c88_30, %c8] : memref<704x128xf32, #tpu.memory_space<vmem>>, vector<8x1xf32>
    %cst_31 = arith.constant dense<0.000000e+00> : vector<32x32xf32>
    %51 = tpu.matmul %49, %48, %cst_31 {dimension_numbers = #tpu.dot_dimension_numbers<[1], [0], [0], [1], [0, 0, 1, 1], [], []>} : vector<32x8xf32>, vector<8x32xf32>, vector<32x32xf32> -> vector<32x32xf32>
    %cst_32 = arith.constant 0.000000e+00 : f32
    %52 = vector.broadcast %cst_32 : f32 to vector<8x32xf32>
    %c544 = arith.constant 544 : index
    %c0_33 = arith.constant 0 : index
    %53 = vector.load %arg1[%c544, %c0_33] : memref<704x128xf32, #tpu.memory_space<vmem>>, vector<32x32xf32>
    %54 = vector.extract_strided_slice %51 {offsets = [0, 0], sizes = [8, 32], strides = [1, 1]} : vector<32x32xf32> to vector<8x32xf32>
    %cst_34 = arith.constant dense<0.000000e+00> : vector<8x32xf32>
    %55 = tpu.matmul %54, %53, %cst_34 {dimension_numbers = #tpu.dot_dimension_numbers<[1], [0], [0], [1], [0, 0, 1, 1], [], []>} : vector<8x32xf32>, vector<32x32xf32>, vector<8x32xf32> -> vector<8x32xf32>
    %56 = arith.addf %52, %55 : vector<8x32xf32>
    %c576 = arith.constant 576 : index
    %c0_35 = arith.constant 0 : index
    %57 = vector.load %arg1[%c576, %c0_35] : memref<704x128xf32, #tpu.memory_space<vmem>>, vector<32x32xf32>
    %58 = vector.extract_strided_slice %51 {offsets = [8, 0], sizes = [8, 32], strides = [1, 1]} : vector<32x32xf32> to vector<8x32xf32>
    %cst_36 = arith.constant dense<0.000000e+00> : vector<8x32xf32>
    %59 = tpu.matmul %58, %57, %cst_36 {dimension_numbers = #tpu.dot_dimension_numbers<[1], [0], [0], [1], [0, 0, 1, 1], [], []>} : vector<8x32xf32>, vector<32x32xf32>, vector<8x32xf32> -> vector<8x32xf32>
    %60 = arith.addf %56, %59 : vector<8x32xf32>
    %c608 = arith.constant 608 : index
    %c0_37 = arith.constant 0 : index
    %61 = vector.load %arg1[%c608, %c0_37] : memref<704x128xf32, #tpu.memory_space<vmem>>, vector<32x32xf32>
    %62 = vector.extract_strided_slice %51 {offsets = [16, 0], sizes = [8, 32], strides = [1, 1]} : vector<32x32xf32> to vector<8x32xf32>
    %cst_38 = arith.constant dense<0.000000e+00> : vector<8x32xf32>
    %63 = tpu.matmul %62, %61, %cst_38 {dimension_numbers = #tpu.dot_dimension_numbers<[1], [0], [0], [1], [0, 0, 1, 1], [], []>} : vector<8x32xf32>, vector<32x32xf32>, vector<8x32xf32> -> vector<8x32xf32>
    %64 = arith.addf %60, %63 : vector<8x32xf32>
    %c640 = arith.constant 640 : index
    %c0_39 = arith.constant 0 : index
    %65 = vector.load %arg1[%c640, %c0_39] : memref<704x128xf32, #tpu.memory_space<vmem>>, vector<32x32xf32>
    %66 = vector.extract_strided_slice %51 {offsets = [24, 0], sizes = [8, 32], strides = [1, 1]} : vector<32x32xf32> to vector<8x32xf32>
    %cst_40 = arith.constant dense<0.000000e+00> : vector<8x32xf32>
    %67 = tpu.matmul %66, %65, %cst_40 {dimension_numbers = #tpu.dot_dimension_numbers<[1], [0], [0], [1], [0, 0, 1, 1], [], []>} : vector<8x32xf32>, vector<32x32xf32>, vector<8x32xf32> -> vector<8x32xf32>
    %68 = arith.addf %64, %67 : vector<8x32xf32>
    %69 = vector.broadcast %50 : vector<8x1xf32> to vector<8x32xf32>
    %70 = arith.addf %68, %69 : vector<8x32xf32>
    %c120 = arith.constant 120 : index
    %c0_41 = arith.constant 0 : index
    %71 = vector.load %arg1[%c120, %c0_41] : memref<704x128xf32, #tpu.memory_space<vmem>>, vector<8x32xf32>
    %c120_42 = arith.constant 120 : index
    %c32 = arith.constant 32 : index
    %72 = vector.load %arg1[%c120_42, %c32] : memref<704x128xf32, #tpu.memory_space<vmem>>, vector<1x1xf32>
    %73 = arith.mulf %70, %71 : vector<8x32xf32>
    %cst_43 = arith.constant 1.000000e+00 : f32
    %74 = vector.broadcast %cst_43 : f32 to vector<8x8xf32>
    %cst_44 = arith.constant dense<0.000000e+00> : vector<8x32xf32>
    %75 = tpu.matmul %74, %73, %cst_44 {dimension_numbers = #tpu.dot_dimension_numbers<[1], [0], [0], [1], [0, 0, 1, 1], [], []>} : vector<8x8xf32>, vector<8x32xf32>, vector<8x32xf32> -> vector<8x32xf32>
    %c672 = arith.constant 672 : index
    %c0_45 = arith.constant 0 : index
    %76 = vector.load %arg1[%c672, %c0_45] : memref<704x128xf32, #tpu.memory_space<vmem>>, vector<32x128xf32>
    %cst_46 = arith.constant dense<0.000000e+00> : vector<8x128xf32>
    %77 = tpu.matmul %75, %76, %cst_46 {dimension_numbers = #tpu.dot_dimension_numbers<[1], [0], [0], [1], [0, 0, 1, 1], [], []>} : vector<8x32xf32>, vector<32x128xf32>, vector<8x128xf32> -> vector<8x128xf32>
    %78 = vector.broadcast %72 : vector<1x1xf32> to vector<8x128xf32>
    %79 = arith.addf %77, %78 : vector<8x128xf32>
    %c0_47 = arith.constant 0 : index
    %c0_48 = arith.constant 0 : index
    %80 = vector.load %arg2[%c0_47, %c0_48] : memref<8x128xf32, #tpu.memory_space<vmem>>, vector<8x128xf32>
    tpu.vector_store %arg2[%c0_47, %c0_48], %79 {strides = array<i32>} : memref<8x128xf32, #tpu.memory_space<vmem>>, vector<8x128xf32>,
    return
  }
}

</mosaic_0001>

<bundles_post_ra>
// kernel: cnn_forward_packed.1
= control target key start
LH: loop header
LB: loop body
LE: loop exit
PB: predicated region body
PF: predicated region fallthrough
CT: control target
= control target key end

     0   :  { %v2214_v0 = vmov 0.0|0.0   ;;  %vm2215_vm0 = vmmov 0   ;;  %v2216_v4 = vmov 0.0   ;;  %v2217_v7 = vmov 64   ;;  %s2221_s29 = smov 96   ;;  %s2653_s0 = inlined_call_operand.vmem [shape: f32[64,80], index: 0, kind: input, shape index: {}]   ;;  %s2654_s1 = inlined_call_operand.vmem [shape: f32[704,128], index: 1, kind: input, shape index: {}]   ;;  %s2655_s2 = inlined_call_operand.vmem [shape: f32[8,128], index: 2, kind: output, shape index: {}]  }
   0x1   :  { %2076 = vmatprep.subr.bf16.mxu0 %v2214_v0  ;;  %v11_v1 = vld [vmem:[%s2653_s0] sm:$0xff]  ;;  %v12_v2 = vld [vmem:[%s2653_s0 + $0x8] sm:$0xff]  ;;  %v13_v3 = vld [vmem:[%s2653_s0 + $0x10] sm:$0xff]  ;;  %1835 = vmatprep.mubr.msk.f32.mxu0 %vm2215_vm0, %v2216_v4  ;;  %vm37_vm1 = vcmask 523264   ;;  %vm144_vm2 = vcmask 654336   ;;  %vm325_vm3 = vcmask 195584  }
   0x2   :  { %v2077_v5 = vpack.c.bf16 %v12_v2, %v11_v1  ;;  %v14_v6 = vld [vmem:[%s2653_s0 + $0x18] sm:$0xff]  ;;  %2210 = vset.pattern.permute.xlu0 %v2217_v7  ;;  %2211 = vset.pattern.permute.xlu1 %v2217_v7  ;;  %v19_v8 = vld [vmem:[%s2654_s1] sm:$0xff]  ;;  %v21_v10 = vld [vmem:[%s2654_s1 + $0x10] sm:$0xff]  ;;  %vm463_vm4 = vcmask 261120   ;;  %vm1087_vm5 = vcmask 64512  }
   0x3   :  { %2088 = vmatprep.subr.bf16.mxu1 %v2214_v0  ;;  %1864 = vmatprep.mubr.msk.f32.mxu1 %vm2215_vm0, %v2216_v4  ;;  %v2080_v9 = vpack.c.bf16 %v14_v6, %v13_v3  ;;  %v124_v11 = vld [vmem:[%s2654_s1 + $0x80] sm:$0xff]  ;;  %v16_v13 = vld [vmem:[%s2653_s0 + $0x28] sm:$0xff]  ;;  %v126_v16 = vld [vmem:[%s2654_s1 + $0x90] sm:$0xff] }
   0x4   :  { %2078 = vmatpush3.bf16.msra.mxu0 %v2077_v5  ;;  %24 = vperm.xlu0 %2210, %v19_v8   ;;  %v15_v12 = vld [vmem:[%s2653_s0 + $0x20] sm:$0xff]  ;;  %v125_v14 = vld [vmem:[%s2654_s1 + $0x88] sm:$0xff]  ;;  %v127_v17 = vld [vmem:[%s2654_s1 + $0x98] sm:$0xff] }
   0x5   :  { %2079 = vmatprep.subr.bf16.mxu0 %v2214_v0  ;;  %34 = vperm.xlu1 %2211, %v21_v10   ;;  %v2089_v15 = vpack.c.bf16 %v125_v14, %v124_v11  ;;  %v20_v18 = vld [vmem:[%s2654_s1 + $0x8] sm:$0xff]  ;;  %v2083_v19 = vpack.c.bf16 %v16_v13, %v15_v12  ;;  %v17_v20 = vld [vmem:[%s2653_s0 + $0x30] sm:$0xff]  ;;  %v18_v21 = vld [vmem:[%s2653_s0 + $0x38] sm:$0xff]  ;;  %v2092_v22 = vpack.c.bf16 %v127_v17, %v126_v16 }
   0x6   :  { %v128_v23 = vld [vmem:[%s2654_s1 + $0xa0] sm:$0xff]  ;;  %v129_v24 = vld [vmem:[%s2654_s1 + $0xa8] sm:$0xff]  ;;  %v2086_v25 = vpack.c.bf16 %v18_v21, %v17_v20  ;;  %v134_v26 = vld [vmem:[%s2654_s1 + $0xd0] sm:$0xff] }
   0x7   :  { %2090 = vmatpush3.bf16.msra.mxu1 %v2089_v15  ;;  %v135_v27 = vld [vmem:[%s2654_s1 + $0xd8] sm:$0xff]  ;;  %v2095_v28 = vpack.c.bf16 %v129_v24, %v128_v23  ;;  %v130_v29 = vld [vmem:[%s2654_s1 + $0xb0] sm:$0xff]  ;;  %v136_v32 = vld [vmem:[%s2654_s1 + $0xe0] sm:$0xff] }
   0x8   :  { %2081 = vmatpush3.bf16.msra.mxu0 %v2080_v9  ;;  %29 = vperm.xlu0 %2210, %v20_v18   ;;  %v131_v30 = vld [vmem:[%s2654_s1 + $0xb8] sm:$0xff]  ;;  %v2104_v31 = vpack.c.bf16 %v135_v27, %v134_v26  ;;  %v137_v33 = vld [vmem:[%s2654_s1 + $0xe8] sm:$0xff]  ;;  %v132_v35 = vld [vmem:[%s2654_s1 + $0xc0] sm:$0xff] }
   0x9   :  { %2082 = vmatprep.subr.bf16.mxu0 %v2214_v0  ;;  %2091 = vmatprep.subr.bf16.mxu1 %v2214_v0  ;;  %v2098_v34 = vpack.c.bf16 %v131_v30, %v130_v29  ;;  %v133_v36 = vld [vmem:[%s2654_s1 + $0xc8] sm:$0xff]  ;;  %v2107_v37 = vpack.c.bf16 %v137_v33, %v136_v32  ;;  %v138_v38 = vld [vmem:[%s2654_s1 + $0xf0] sm:$0xff]  ;;  %v139_v39 = vld [vmem:[%s2654_s1 + $0xf8] sm:$0xff] }
   0xa   :  { %v2101_v40 = vpack.c.bf16 %v133_v36, %v132_v35  ;;  %v2110_v41 = vpack.c.bf16 %v139_v39, %v138_v38  ;;  %v140_v42 = vld [vmem:[%s2654_s1 + $0x100] sm:$0xff]  ;;  %v141_v43 = vld [vmem:[%s2654_s1 + $0x108] sm:$0xff]  ;;  %v142_v45 = vld [vmem:[%s2654_s1 + $0x110] sm:$0xff] }
   0xb   :  { %2093 = vmatpush3.bf16.msra.mxu1 %v2092_v22  ;;  %v2113_v44 = vpack.c.bf16 %v141_v43, %v140_v42  ;;  %v143_v46 = vld [vmem:[%s2654_s1 + $0x118] sm:$0xff]  ;;  %v459_v61 = vld [vmem:[%s2654_s1 + $0x140] sm:$0xff]  ;;  %v460_v62 = vld [vmem:[%s2654_s1 + $0x148] sm:$0xff] }
   0xc   :  { %2084 = vmatpush3.bf16.msra.mxu0 %v2083_v19  ;;  %2094 = vmatprep.subr.bf16.mxu1 %v2214_v0  ;;  %v2116_v47 = vpack.c.bf16 %v143_v46, %v142_v45  ;;  %v317_v60 = vld [vmem:[%s2654_s1 + $0x18] sm:$0xff]  ;;  %v2123_v63 = vpack.c.bf16 %v460_v62, %v459_v61  ;;  %v461_v1 = vld [vmem:[%s2654_s1 + $0x150] sm:$0xff]  ;;  %v455_v21 = vld [vmem:[%s2654_s1 + $0x120] sm:$0xff] }
   0xd   :  { %2085 = vmatprep.subr.bf16.mxu0 %v2214_v0  ;;  %v462_v2 = vld [vmem:[%s2654_s1 + $0x158] sm:$0xff]  ;;  %v456_v22 = vld [vmem:[%s2654_s1 + $0x128] sm:$0xff]  ;;  %v318_v23 = vld [vmem:[%s2654_s1 + $0x20] sm:$0xff] }
   0xe   :  { %v2126_v3 = vpack.c.bf16 %v462_v2, %v461_v1  ;;  %v2129_v24 = vpack.c.bf16 %v456_v22, %v455_v21  ;;  %v457_v26 = vld [vmem:[%s2654_s1 + $0x130] sm:$0xff]  ;;  %v458_v27 = vld [vmem:[%s2654_s1 + $0x138] sm:$0xff]  ;;  %v323_v32 = vld [vmem:[%s2654_s1 + $0x48] sm:$0xff] }
   0xf   :  { %2096 = vmatpush3.bf16.msra.mxu1 %v2095_v28  ;;  %v320_v28 = vld [vmem:[%s2654_s1 + $0x30] sm:$0xff]  ;;  %v2132_v29 = vpack.c.bf16 %v458_v27, %v457_v26  ;;  %v321_v30 = vld [vmem:[%s2654_s1 + $0x38] sm:$0xff]  ;;  %v610_v35 = vld [vmem:[%s2654_s1 + $0x160] sm:$0xff] }
  0x10   :  { %2087 = vmatpush3.bf16.msra.mxu0 %v2086_v25  ;;  %2097 = vmatprep.subr.bf16.mxu1 %v2214_v0  ;;  %v319_v25 = vld [vmem:[%s2654_s1 + $0x28] sm:$0xff]  ;;  %v324_v33 = vld [vmem:[%s2654_s1 + $0x50] sm:$0xff]  ;;  %v613_v42 = vld [vmem:[%s2654_s1 + $0x178] sm:$0xff] }
  0x11   :  { %2103 = vmatprep.subr.bf16.mxu0 %v2214_v0  ;;  %v611_v36 = vld [vmem:[%s2654_s1 + $0x168] sm:$0xff]  ;;  %v691_v45 = vld [vmem:[%s2654_s1 + $0x198] sm:$0xff]  ;;  %v922_v2 = vld [vmem:[%s2654_s1 + $0x1e0] sm:$0xff] }
  0x12   :  { %v689_v38 = vld [vmem:[%s2654_s1 + $0x188] sm:$0xff]  ;;  %v2135_v39 = vpack.c.bf16 %v611_v36, %v610_v35  ;;  %v847_v61 = vld [vmem:[%s2654_s1 + $0x1d8] sm:$0xff]  ;;  %v1187_v21 = vld [vmem:[%s2654_s1 + $0x230] sm:$0xff] }
  0x13   :  { %1836 = vmatmul.mubr.msk.f32.vlgmr.msra.gmra.mrb[0].mxu0 %vm37_vm1, %v19_v8  ;;  %2099 = vmatpush3.bf16.msra.mxu1 %v2098_v34  ;;  %v2218_v34 = vmov 24   ;;  %v1188_v22 = vld [vmem:[%s2654_s1 + $0x238] sm:$0xff] }
  0x14   :  { %1838 = vmatprep.mubr.msk.f32.mxu0 %vm2215_vm0, %v2216_v4  ;;  %2105 = vmatpush3.bf16.msra.mxu0 %v2104_v31  ;;  %v322_v31 = vld [vmem:[%s2654_s1 + $0x40] sm:$0xff] }
  0x15   :  { %2106 = vmatprep.subr.bf16.mxu0 %v2214_v0  ;;  %2100 = vmatprep.subr.bf16.mxu1 %v2214_v0 }
  0x16   :  { %2212 = vset.pattern.permute.xlu1 %v2218_v34 }
  0x17   :  { %1839 = vmatmul.mubr.msk.f32.gmra.mrb[2].mxu0 %vm37_vm1, %v20_v18  ;;  %2102 = vmatpush3.bf16.msra.mxu1 %v2101_v40 }
  0x18   :  { %1841 = vmatprep.mubr.msk.f32.mxu0 %vm2215_vm0, %v2216_v4  ;;  %2108 = vmatpush3.bf16.msra.mxu0 %v2107_v37  ;;  %v688_v37 = vld [vmem:[%s2654_s1 + $0x180] sm:$0xff] }
  0x19   :  { %2109 = vmatprep.subr.bf16.mxu0 %v2214_v0  ;;  %1079 = vperm.xlu1 %2212, %v317_v60   ;;  %v2141_v40 = vpack.c.bf16 %v689_v38, %v688_v37 }
  0x1b   :  { %1842 = vmatmul.mubr.msk.f32.gmra.mrb[4].mxu0 %vm37_vm1, %v21_v10 }
  0x1c   :  { %2111 = vmatpush3.bf16.msra.mxu0 %v2110_v41  ;;  %1893 = vmatprep.mubr.msk.f32.mxu0 %vm2215_vm0, %v2216_v4  ;;  %v612_v41 = vld [vmem:[%s2654_s1 + $0x170] sm:$0xff] }
  0x1d   :  { %2112 = vmatprep.subr.bf16.mxu0 %v2214_v0 }
  0x20   :  { %2114 = vmatpush3.bf16.msra.mxu0 %v2113_v44  ;;  %v690_v44 = vld [vmem:[%s2654_s1 + $0x190] sm:$0xff] }
  0x21   :  { %2115 = vmatprep.subr.bf16.mxu0 %v2214_v0 }
  0x24   :  { %2117 = vmatpush3.bf16.msra.mxu0 %v2116_v47  ;;  %v2138_v47 = vpack.c.bf16 %v613_v42, %v612_v41 }
  0x25   :  { %2122 = vmatprep.subr.bf16.mxu0 %v2214_v0 }
  0x83   :  { %v25_v48 = vpop.permute.xlu0 %24 }
  0x84   :  { %v35_v56 = vpop.permute.xlu1 %34 }
  0x87   :  { %v30_v52 = vpop.permute.xlu0 %29 }
  0xe6   :  { %v110_v49 = vpop.f32.mrb[0].mxu0 }
  0xe7   :  { %v111_v50 = vadd.f32 %v110_v49, %v25_v48  ;;  %v1837_v51 = vpop.f32.mrb[1].mxu0  ;;  %v2144_v48 = vpack.c.bf16 %v691_v45, %v690_v44  ;;  %v766_v49 = vld [vmem:[%s2654_s1 + $0x1a0] sm:$0xff] }
  0xe9   :  { %1865 = vmatmul.mubr.msk.f32.vlgmr.msra.gmra.mrb[0].mxu1 %vm144_vm2, %v111_v50  ;;  %1894 = vmatmul.mubr.msk.f32.vlgmr.msra.gmra.mrb[6].mxu0 %vm144_vm2, %v111_v50  ;;  %v767_v50 = vld [vmem:[%s2654_s1 + $0x1a8] sm:$0xff] }
  0xea   :  { %v115_v53 = vpop.f32.mrb[2].mxu0  ;;  %1867 = vmatprep.mubr.msk.f32.mxu1 %vm2215_vm0, %v2216_v4  ;;  %1896 = vmatprep.mubr.msk.f32.mxu0 %vm2215_vm0, %v2216_v4 }
  0xeb   :  { %v116_v54 = vadd.f32 %v115_v53, %v30_v52  ;;  %v1840_v55 = vpop.f32.mrb[3].mxu0  ;;  %2124 = vmatpush3.bf16.msra.mxu0 %v2123_v63  ;;  %v844_v52 = vld [vmem:[%s2654_s1 + $0x1c0] sm:$0xff]  ;;  %v845_v53 = vld [vmem:[%s2654_s1 + $0x1c8] sm:$0xff] }
  0xec   :  { %2125 = vmatprep.subr.bf16.mxu0 %v2214_v0  ;;  %v2147_v55 = vpack.c.bf16 %v767_v50, %v766_v49  ;;  %v1190_v49 = vld [vmem:[%s2654_s1 + $0x248] sm:$0xff] }
  0xed   :  { %1868 = vmatmul.mubr.msk.f32.gmra.mrb[2].mxu1 %vm144_vm2, %v116_v54  ;;  %1897 = vmatmul.mubr.msk.f32.gmra.mrb[8].mxu0 %vm144_vm2, %v116_v54 }
  0xee   :  { %v120_v57 = vpop.f32.mrb[4].mxu0  ;;  %1870 = vmatprep.mubr.msk.f32.mxu1 %vm2215_vm0, %v2216_v4  ;;  %1899 = vmatprep.mubr.msk.f32.mxu0 %vm2215_vm0, %v2216_v4 }
  0xef   :  { %v121_v58 = vadd.f32 %v120_v57, %v35_v56  ;;  %v1843_v59 = vpop.f32.mrb[5].mxu0  ;;  %2127 = vmatpush3.bf16.msra.mxu0 %v2126_v3  ;;  %v2153_v56 = vpack.c.bf16 %v845_v53, %v844_v52  ;;  %v768_v57 = vld [vmem:[%s2654_s1 + $0x1b0] sm:$0xff]  ;;  %v923_v3 = vld [vmem:[%s2654_s1 + $0x1e8] sm:$0xff] }
  0xf0   :  { %2134 = vmatprep.subr.bf16.mxu0 %v2214_v0  ;;  %v1085_v53 = vld [vmem:[%s2654_s1 + $0x68] sm:$0xff] }
  0xf1   :  { %1871 = vmatmul.mubr.msk.f32.gmra.mrb[4].mxu1 %vm144_vm2, %v121_v58  ;;  %1900 = vmatmul.mubr.msk.f32.gmra.mrb[10].mxu0 %vm144_vm2, %v121_v58  ;;  %v769_v58 = vld [vmem:[%s2654_s1 + $0x1b8] sm:$0xff] }
  0xf2   :  { %1928 = vmatprep.mubr.msk.f32.mxu0 %vm2215_vm0, %v2216_v4  ;;  %1908 = vmatprep.mubr.msk.f32.mxu1 %vm325_vm3, %v317_v60  ;;  %v846_v60 = vld [vmem:[%s2654_s1 + $0x1d0] sm:$0xff]  ;;  %v2150_v63 = vpack.c.bf16 %v769_v58, %v768_v57  ;;  %v2219_v58 = vmov 8  }
  0xf3   :  { %v2156_v1 = vpack.c.bf16 %v847_v61, %v846_v60  ;;  %2213 = vset.pattern.permute.xlu0 %v2219_v58  ;;  %v1340_v60 = vld [vmem:[%s2654_s1 + $0x268] sm:$0xff]  ;;  %v1417_v61 = vld [vmem:[%s2654_s1 + $0x280] sm:$0xff] }
 0x1bc   :  { %v220_v5 = vpop.f32.mrb[0].mxu1  ;;  %v300_v6 = vpop.f32.mrb[6].mxu0 }
 0x1bd   :  { %v314_v7 = vmax.f32 %v220_v5, %v300_v6  ;;  %v1866_v8 = vpop.f32.mrb[1].mxu1  ;;  %v1895_v9 = vpop.f32.mrb[7].mxu0  ;;  %v1000_v5 = vld [vmem:[%s2654_s1 + $0x200] sm:$0xff]  ;;  %v1001_v6 = vld [vmem:[%s2654_s1 + $0x208] sm:$0xff] }
 0x1be   :  { %v2159_v9 = vpack.c.bf16 %v923_v3, %v922_v2  ;;  %v1341_v2 = vld [vmem:[%s2654_s1 + $0x270] sm:$0xff]  ;;  %v1342_v3 = vld [vmem:[%s2654_s1 + $0x278] sm:$0xff] }
 0x1c0   :  { %v225_v10 = vpop.f32.mrb[2].mxu1  ;;  %v305_v11 = vpop.f32.mrb[8].mxu0 }
 0x1c1   :  { %v315_v12 = vmax.f32 %v225_v10, %v305_v11  ;;  %v1869_v13 = vpop.f32.mrb[3].mxu1  ;;  %v1898_v14 = vpop.f32.mrb[9].mxu0  ;;  %v2165_v10 = vpack.c.bf16 %v1001_v6, %v1000_v5  ;;  %v924_v11 = vld [vmem:[%s2654_s1 + $0x1f0] sm:$0xff] }
 0x1c2   :  { %v1002_v13 = vld [vmem:[%s2654_s1 + $0x210] sm:$0xff]  ;;  %v1003_v14 = vld [vmem:[%s2654_s1 + $0x218] sm:$0xff] }
 0x1c3   :  { %v2118_v15 = vpack.c.bf16 %v315_v12, %v314_v7  ;;  %v925_v12 = vld [vmem:[%s2654_s1 + $0x1f8] sm:$0xff]  ;;  %v1419_v6 = vld [vmem:[%s2654_s1 + $0x290] sm:$0xff] }
 0x1c4   :  { %v230_v16 = vpop.f32.mrb[4].mxu1  ;;  %v310_v17 = vpop.f32.mrb[10].mxu0 }
 0x1c5   :  { %2119 = vmatprep.subr.bf16.mxu1 %v2118_v15  ;;  %v316_v18 = vmax.f32 %v230_v16, %v310_v17  ;;  %v1872_v19 = vpop.f32.mrb[5].mxu1  ;;  %v1901_v20 = vpop.f32.mrb[11].mxu0  ;;  %v2168_v16 = vpack.c.bf16 %v1003_v14, %v1002_v13  ;;  %v1083_v17 = vld [vmem:[%s2654_s1 + $0x58] sm:$0xff]  ;;  %v1576_v13 = vld [vmem:[%s2654_s1 + $0x2a0] sm:$0xff]  ;;  %v1577_v14 = vld [vmem:[%s2654_s1 + $0x2a8] sm:$0xff] }
 0x1c6   :  { %2121 = vmatpush3.bf16.msra.mxu1 %v2118_v15  ;;  %v2162_v15 = vpack.c.bf16 %v925_v12, %v924_v11  ;;  %v1186_v19 = vld [vmem:[%s2654_s1 + $0x228] sm:$0xff]  ;;  %1496 = vperm.xlu0 %2213, %v1083_v17  }
 0x1c7   :  { %1906 = vmatprep.subr.mxu1 %v316_v18 }
 0x1ca   :  { %1907 = vmatpush3.msra.mxu1 %v316_v18  ;;  %v1185_v18 = vld [vmem:[%s2654_s1 + $0x220] sm:$0xff] }
 0x1cb   :  { %1909 = vmatmul.mubr.msk.f32.vlgmr.msra.gmra.mrb[6].mxu1 %vm325_vm3, %v318_v23  ;;  %2128 = vmatprep.subr.bf16.mxu1 %v2214_v0  ;;  %v2177_v20 = vpack.c.bf16 %v1186_v19, %v1185_v18  ;;  %v2180_v23 = vpack.c.bf16 %v1188_v22, %v1187_v21 }
 0x1cc   :  { %1911 = vmatprep.mubr.msk.f32.mxu1 %vm325_vm3, %v319_v25  ;;  %2130 = vmatpush3.bf16.msra.mxu1 %v2129_v24 }
 0x1cd   :  { %2131 = vmatprep.subr.bf16.mxu1 %v2214_v0 }
 0x1cf   :  { %1912 = vmatmul.mubr.msk.f32.gmra.mrb[8].mxu1 %vm325_vm3, %v320_v28 }
 0x1d0   :  { %1914 = vmatprep.mubr.msk.f32.mxu1 %vm325_vm3, %v321_v30  ;;  %2133 = vmatpush3.bf16.msra.mxu1 %v2132_v29 }
 0x1d1   :  { %2140 = vmatprep.subr.bf16.mxu1 %v2214_v0 }
 0x1d3   :  { %1915 = vmatmul.mubr.msk.f32.gmra.mrb[10].mxu1 %vm325_vm3, %v322_v31 }
 0x1d4   :  { %1917 = vmatprep.mubr.msk.f32.mxu1 %vm325_vm3, %v323_v32 }
 0x1d7   :  { %1918 = vmatmul.mubr.msk.f32.gmra.mrb[12].mxu1 %vm325_vm3, %v324_v33 }
 0x1d8   :  { %1939 = vmatprep.mubr.msk.f32.mxu1 %vm2215_vm0, %v2216_v4 }
 0x29e   :  { %v1910_v43 = vpop.f32.mrb[6].mxu1 }
 0x29f   :  { %1929 = vmatmul.mubr.msk.f32.vlgmr.msra.gmra.mrb[12].mxu0 %vm463_vm4, %v1910_v43  ;;  %v416_v46 = vpop.f32.mrb[7].mxu1 }
 0x2a0   :  { %2136 = vmatpush3.bf16.msra.mxu0 %v2135_v39  ;;  %1940 = vmatmul.mubr.msk.f32.vlgmr.msra.gmra.mrb[14].mxu1 %vm463_vm4, %v416_v46  ;;  %v1080_v46 = vpop.permute.xlu1 %1079 }
 0x2a1   :  { %2142 = vmatpush3.bf16.msra.mxu1 %v2141_v40  ;;  %2137 = vmatprep.subr.bf16.mxu0 %v2214_v0 }
 0x2a2   :  { %v1913_v51 = vpop.f32.mrb[8].mxu1  ;;  %2143 = vmatprep.subr.bf16.mxu1 %v2214_v0  ;;  %1950 = vmatprep.mubr.msk.f32.mxu0 %vm2215_vm0, %v2216_v4 }
 0x2a3   :  { %v426_v54 = vpop.f32.mrb[9].mxu1  ;;  %1961 = vmatprep.mubr.msk.f32.mxu1 %vm2215_vm0, %v2216_v4 }
 0x2a4   :  { %2139 = vmatpush3.bf16.msra.mxu0 %v2138_v47 }
 0x2a5   :  { %2145 = vmatpush3.bf16.msra.mxu1 %v2144_v48  ;;  %2146 = vmatprep.subr.bf16.mxu0 %v2214_v0  ;;  %v1189_v48 = vld [vmem:[%s2654_s1 + $0x240] sm:$0xff] }
 0x2a6   :  { %2152 = vmatprep.subr.bf16.mxu1 %v2214_v0  ;;  %v1916_v59 = vpop.f32.mrb[10].mxu1  ;;  %v2171_v52 = vpack.c.bf16 %v1190_v49, %v1189_v48 }
 0x2a7   :  { %1951 = vmatmul.mubr.msk.f32.vlgmr.msra.gmra.mrb[14].mxu0 %vm463_vm4, %v426_v54  ;;  %v436_v62 = vpop.f32.mrb[11].mxu1  ;;  %v1191_v54 = vld [vmem:[%s2654_s1 + $0x250] sm:$0xff] }
 0x2a8   :  { %2148 = vmatpush3.bf16.msra.mxu0 %v2147_v55  ;;  %1962 = vmatmul.mubr.msk.f32.vlgmr.msra.gmra.mrb[16].mxu1 %vm463_vm4, %v1913_v51  ;;  %v1084_v51 = vld [vmem:[%s2654_s1 + $0x60] sm:$0xff]  ;;  %v1192_v55 = vld [vmem:[%s2654_s1 + $0x258] sm:$0xff] }
 0x2a9   :  { %2154 = vmatpush3.bf16.msra.mxu1 %v2153_v56  ;;  %2149 = vmatprep.subr.bf16.mxu0 %v2214_v0  ;;  %v1086_v56 = vld [vmem:[%s2654_s1 + $0x70] sm:$0xff]  ;;  %v2174_v57 = vpack.c.bf16 %v1192_v55, %v1191_v54 }
 0x2aa   :  { %2155 = vmatprep.subr.bf16.mxu1 %v2214_v0  ;;  %1972 = vmatprep.mubr.msk.f32.mxu0 %vm2215_vm0, %v2216_v4  ;;  %v1919_v7 = vpop.f32.mrb[12].mxu1 }
 0x2ab   :  { %1983 = vmatprep.mubr.msk.f32.mxu1 %vm2215_vm0, %v2216_v4  ;;  %v446_v8 = vpop.f32.mrb[13].mxu1 }
 0x2ac   :  { %2151 = vmatpush3.bf16.msra.mxu0 %v2150_v63 }
 0x2ad   :  { %2157 = vmatpush3.bf16.msra.mxu1 %v2156_v1  ;;  %2158 = vmatprep.subr.bf16.mxu0 %v2214_v0 }
 0x2ae   :  { %2164 = vmatprep.subr.bf16.mxu1 %v2214_v0 }
 0x2af   :  { %1973 = vmatmul.mubr.msk.f32.vlgmr.msra.gmra.mrb[16].mxu0 %vm463_vm4, %v436_v62  ;;  %v1418_v62 = vld [vmem:[%s2654_s1 + $0x288] sm:$0xff] }
 0x2b0   :  { %2160 = vmatpush3.bf16.msra.mxu0 %v2159_v9  ;;  %1984 = vmatmul.mubr.msk.f32.vlgmr.msra.gmra.mrb[18].mxu1 %vm463_vm4, %v1916_v59  ;;  %v1339_v59 = vld [vmem:[%s2654_s1 + $0x260] sm:$0xff]  ;;  %v2189_v1 = vpack.c.bf16 %v1418_v62, %v1417_v61  ;;  %v2186_v9 = vpack.c.bf16 %v1342_v3, %v1341_v2 }
 0x2b1   :  { %2166 = vmatpush3.bf16.msra.mxu1 %v2165_v10  ;;  %2161 = vmatprep.subr.bf16.mxu0 %v2214_v0  ;;  %v2183_v63 = vpack.c.bf16 %v1340_v60, %v1339_v59 }
 0x2b2   :  { %2167 = vmatprep.subr.bf16.mxu1 %v2214_v0  ;;  %1994 = vmatprep.mubr.msk.f32.mxu0 %vm2215_vm0, %v2216_v4 }
 0x2b3   :  { %2005 = vmatprep.mubr.msk.f32.mxu1 %vm2215_vm0, %v2216_v4 }
 0x2b4   :  { %2163 = vmatpush3.bf16.msra.mxu0 %v2162_v15  ;;  %v1578_v15 = vld [vmem:[%s2654_s1 + $0x2b0] sm:$0xff] }
 0x2b5   :  { %2169 = vmatpush3.bf16.msra.mxu1 %v2168_v16  ;;  %2176 = vmatprep.subr.bf16.mxu0 %v2214_v0  ;;  %v2195_v16 = vpack.c.bf16 %v1577_v14, %v1576_v13 }
 0x2b7   :  { %1995 = vmatmul.mubr.msk.f32.vlgmr.msra.gmra.mrb[18].mxu0 %vm463_vm4, %v446_v8 }
 0x2b8   :  { %2006 = vmatmul.mubr.msk.f32.vlgmr.msra.gmra.mrb[20].mxu1 %vm463_vm4, %v1919_v7  ;;  %2035 = vmatprep.mubr.msk.f32.mxu0 %vm2215_vm0, %v2216_v4  ;;  %v1420_v7 = vld [vmem:[%s2654_s1 + $0x298] sm:$0xff] }
 0x2b9   :  { %2010 = vmatprep.mubr.msk.f32.mxu1 %vm1087_vm5, %v1083_v17  ;;  %2178 = vmatpush3.bf16.msra.mxu0 %v2177_v20  ;;  %v2192_v10 = vpack.c.bf16 %v1420_v7, %v1419_v6  ;;  %v1579_v17 = vld [vmem:[%s2654_s1 + $0x2b8] sm:$0xff] }
 0x2ba   :  { %2179 = vmatprep.subr.bf16.mxu0 %v2214_v0  ;;  %v2198_v18 = vpack.c.bf16 %v1579_v17, %v1578_v15 }
 0x2bd   :  { %2181 = vmatpush3.bf16.msra.mxu0 %v2180_v23 }
 0x2be   :  { %2188 = vmatprep.subr.bf16.mxu0 %v2214_v0 }
 0x372   :  { %v533_v24 = vpop.f32.mrb[12].mxu0 }
 0x373   :  { %v606_v25 = vpop.f32.mrb[14].mxu1  ;;  %v1930_v26 = vpop.f32.mrb[13].mxu0 }
 0x374   :  { %v607_v27 = vadd.f32 %v606_v25, %v533_v24  ;;  %v1941_v28 = vpop.f32.mrb[15].mxu1 }
 0x375   :  { %v1497_v28 = vpop.permute.xlu0 %1496 }
 0x37a   :  { %v683_v29 = vpop.f32.mrb[14].mxu0 }
 0x37b   :  { %v687_v30 = vadd.f32 %v683_v29, %v607_v27  ;;  %v761_v31 = vpop.f32.mrb[16].mxu1  ;;  %v1952_v32 = vpop.f32.mrb[15].mxu0 }
 0x37c   :  { %v1963_v33 = vpop.f32.mrb[17].mxu1 }
 0x37d   :  { %v765_v34 = vadd.f32 %v761_v31, %v687_v30  ;;  %v1500_v30 = vld [vmem:[%s2654_s1 + $0x78] sm:$0xff] }
 0x37e   :  { %v1501_v33 = vld [vmem:[%s2654_s1 + $0x78] sm:$0x1] }
 0x37f   :  { %1581 = vrot.lane.b32.xlu1 %v1501_v33, %s2221_s29 }
 0x382   :  { %v839_v35 = vpop.f32.mrb[16].mxu0 }
 0x383   :  { %v843_v36 = vadd.f32 %v839_v35, %v765_v34  ;;  %v917_v37 = vpop.f32.mrb[18].mxu1  ;;  %v1974_v38 = vpop.f32.mrb[17].mxu0 }
 0x384   :  { %v1985_v39 = vpop.f32.mrb[19].mxu1 }
 0x385   :  { %v921_v40 = vadd.f32 %v917_v37, %v843_v36 }
 0x38a   :  { %v995_v41 = vpop.f32.mrb[18].mxu0 }
 0x38b   :  { %v999_v42 = vadd.f32 %v995_v41, %v921_v40  ;;  %v1073_v43 = vpop.f32.mrb[20].mxu1  ;;  %v1996_v44 = vpop.f32.mrb[19].mxu0 }
 0x38c   :  { %v2007_v45 = vpop.f32.mrb[21].mxu1 }
 0x38d   :  { %v1077_v47 = vadd.f32 %v1073_v43, %v999_v42 }
 0x38f   :  { %v1082_v50 = vadd.f32 %v1080_v46, %v1077_v47 }
 0x391   :  { %2008 = vmatprep.subr.mxu1 %v1082_v50 }
 0x392   :  { %2009 = vmatpush3.msra.mxu1 %v1082_v50 }
 0x393   :  { %2011 = vmatmul.mubr.msk.f32.vlgmr.msra.gmra.mrb[22].mxu1 %vm1087_vm5, %v1084_v51  ;;  %2170 = vmatprep.subr.bf16.mxu1 %v2214_v0 }
 0x394   :  { %2013 = vmatprep.mubr.msk.f32.mxu1 %vm1087_vm5, %v1085_v53  ;;  %2172 = vmatpush3.bf16.msra.mxu1 %v2171_v52 }
 0x395   :  { %2173 = vmatprep.subr.bf16.mxu1 %v2214_v0 }
 0x397   :  { %2014 = vmatmul.mubr.msk.f32.gmra.mrb[24].mxu1 %vm1087_vm5, %v1086_v56 }
 0x398   :  { %2175 = vmatpush3.bf16.msra.mxu1 %v2174_v57  ;;  %2024 = vmatprep.mubr.msk.f32.mxu1 %vm2215_vm0, %v2216_v4 }
 0x399   :  { %2182 = vmatprep.subr.bf16.mxu1 %v2214_v0 }
 0x3f1   :  { %v1582_v34 = vpop.permute.xlu1 %1581 }
 0x3f2   :  { %2200 = vpush %v1582_v34 }
 0x423   :  { %s2201_s30 = spop %2200 }
 0x424   :  { %v1584_v37 = vstv %s2201_s30 }
 0x466   :  { %v2012_v5 = vpop.f32.mrb[22].mxu1 }
 0x467   :  { %2025 = vmatmul.mubr.msk.f32.vlgmr.msra.gmra.mrb[26].mxu1 %vm463_vm4, %v2012_v5  ;;  %v1166_v8 = vpop.f32.mrb[23].mxu1 }
 0x468   :  { %2184 = vmatpush3.bf16.msra.mxu1 %v2183_v63  ;;  %2036 = vmatmul.mubr.msk.f32.vlgmr.msra.gmra.mrb[20].mxu0 %vm463_vm4, %v1166_v8 }
 0x469   :  { %2190 = vmatpush3.bf16.msra.mxu0 %v2189_v1  ;;  %2185 = vmatprep.subr.bf16.mxu1 %v2214_v0 }
 0x46a   :  { %v2015_v11 = vpop.f32.mrb[24].mxu1  ;;  %2191 = vmatprep.subr.bf16.mxu0 %v2214_v0  ;;  %2046 = vmatprep.mubr.msk.f32.mxu1 %vm2215_vm0, %v2216_v4 }
 0x46b   :  { %v1176_v12 = vpop.f32.mrb[25].mxu1  ;;  %2057 = vmatprep.mubr.msk.f32.mxu0 %vm2215_vm0, %v2216_v4 }
 0x46c   :  { %2187 = vmatpush3.bf16.msra.mxu1 %v2186_v9 }
 0x46d   :  { %2193 = vmatpush3.bf16.msra.mxu0 %v2192_v10  ;;  %2060 = vmatprep.subr.mxu1 %v2216_v4 }
 0x46e   :  { %2194 = vmatprep.subr.bf16.mxu0 %v2214_v0 }
 0x46f   :  { %2047 = vmatmul.mubr.msk.f32.vlgmr.msra.gmra.mrb[28].mxu1 %vm463_vm4, %v1176_v12 }
 0x470   :  { %2058 = vmatmul.mubr.msk.f32.vlgmr.msra.gmra.mrb[22].mxu0 %vm463_vm4, %v2015_v11  ;;  %2062 = vmatprep.mubr.msk.f32.mxu1 %vm2215_vm0, %v2216_v4 }
 0x471   :  { %2073 = vmatprep.mubr.msk.f32.mxu0 %vm2215_vm0, %v2216_v4  ;;  %2196 = vmatpush3.bf16.msra.mxu0 %v2195_v16 }
 0x472   :  { %2197 = vmatprep.subr.bf16.mxu0 %v2214_v0  ;;  %v2220_v0 = vmov 1.0  }
 0x475   :  { %2199 = vmatpush3.bf16.msra.mxu0 %v2198_v18 }
 0x53a   :  { %v1262_v4 = vpop.f32.mrb[26].mxu1 }
 0x53b   :  { %v1335_v19 = vpop.f32.mrb[20].mxu0  ;;  %v2026_v20 = vpop.f32.mrb[27].mxu1 }
 0x53c   :  { %v1336_v21 = vadd.f32 %v1335_v19, %v1262_v4  ;;  %v2037_v22 = vpop.f32.mrb[21].mxu0 }
 0x542   :  { %v1412_v23 = vpop.f32.mrb[28].mxu1 }
 0x543   :  { %v1416_v24 = vadd.f32 %v1412_v23, %v1336_v21  ;;  %v1490_v25 = vpop.f32.mrb[22].mxu0  ;;  %v2048_v26 = vpop.f32.mrb[29].mxu1 }
 0x544   :  { %v2059_v27 = vpop.f32.mrb[23].mxu0 }
 0x545   :  { %v1494_v29 = vadd.f32 %v1490_v25, %v1416_v24 }
 0x547   :  { %v1499_v31 = vadd.f32 %v1497_v28, %v1494_v29 }
 0x549   :  { %v1502_v32 = vmul.f32 %v1500_v30, %v1499_v31 }
 0x54b   :  { %2061 = vmatpush3.msra.mxu1 %v1502_v32 }
 0x54c   :  { %2063 = vmatmul.mubr.msk.f32.vlgmr.msra.gmra.mrb[30].mxu1 %vm1087_vm5, %v2220_v0 }
 0x61f   :  { %v1572_v35 = vpop.f32.mrb[30].mxu1 }
 0x620   :  { %v2064_v36 = vpop.f32.mrb[31].mxu1  ;;  %2074 = vmatmul.mubr.msk.f32.vlgmr.msra.gmra.mrb[24].mxu0 %vm463_vm4, %v1572_v35 }
 0x6f3   :  { %v1655_v38 = vpop.f32.mrb[24].mxu0 }
 0x6f4   :  { %v1656_v39 = vadd.f32 %v1655_v38, %v1584_v37  ;;  %v2075_v40 = vpop.f32.mrb[25].mxu0 }
 0x6f6   :  { %1659 = vst [vmem:[%s2655_s2] sm:$0xff] %v1656_v39 }

</bundles_post_ra>
